<compile_context>
chip_gen: v6e
topology: v6e:2x2x1
jax: 0.10.0
libtpu: 0.0.40
codegen_flags: <defaults>
</compile_context>

<pallas_src>
import functools

import jax
import jax.numpy as jnp
from jax.experimental import pallas as pl
from jax.experimental.pallas import tpu as pltpu


def make_positional_encoding(max_len: int, d_model: int, dtype=jnp.float32):
    """Replicates the PyTorch buffer: pe of shape (max_len, 1, d_model)."""
    position = jnp.arange(max_len, dtype=jnp.float32)[:, None]             # (max_len, 1)
    div_term = jnp.exp(
        jnp.arange(0, d_model, 2, dtype=jnp.float32)
        * (-jnp.log(jnp.float32(10000.0)) / d_model)
    )                                                                       # (d_model//2,)
    angles = position * div_term                                            # (max_len, d_model//2)
    pe = jnp.zeros((max_len, d_model), dtype=jnp.float32)
    pe = pe.at[:, 0::2].set(jnp.sin(angles))
    pe = pe.at[:, 1::2].set(jnp.cos(angles))
    return pe[:, None, :].astype(dtype)      # unsqueeze(0).transpose(0,1) -> (max_len, 1, d_model)


def _add_pe_kernel(x_ref, pe_ref, o_ref):
    # x_ref / o_ref: (tile_s, B*D) lane-dense tiles.  pe_ref: (tile_s, D).
    b = x_ref.shape[1] // pe_ref.shape[1]          # static batch factor
    pe = pe_ref[...]
    if b > 1:
        # Lane-axis repeat; with D % 128 == 0 this is vreg-aligned (no cross-lane shuffles).
        pe = jnp.concatenate([pe] * b, axis=-1)
    o_ref[...] = x_ref[...] + pe


def _sublane(itemsize: int) -> int:
    # Minimum sublane tile: 8 for 4-byte, 16 for 2-byte, 32 for 1-byte dtypes.
    return 8 if itemsize >= 4 else (16 if itemsize == 2 else 32)


def _choose_tile_s(S: int, row_bytes: int, itemsize: int, target_bytes: int = 1 << 20) -> int:
    """Pick a sequence tile so each x tile is ~1 MiB, sublane-aligned, and never
    (much) larger than the sequence itself."""
    sub = _sublane(itemsize)
    tile = max(sub, (max(1, target_bytes // max(row_bytes, 1)) // sub) * sub)
    s_pad = pl.cdiv(S, sub) * sub                  # S rounded up to the sublane multiple
    return min(tile, s_pad)


@functools.partial(jax.jit, static_argnames=("tile_s",), donate_argnums=(0,))
def positional_encoding_forward(x, pe, tile_s=None):
    """x: (S, B, D); pe: (max_len, 1, D) buffer.  Returns x + pe[:S] (broadcast over B)."""
    S, B, D = x.shape
    max_len = pe.shape[0]
    if S > max_len:
        raise ValueError(f"sequence length {S} exceeds positional-encoding max_len {max_len}")

    itemsize = jnp.dtype(x.dtype).itemsize
    sub = _sublane(itemsize)
    if tile_s is None:
        tile_s = _choose_tile_s(S, B * D * itemsize, itemsize)
    else:
        tile_s = pl.cdiv(int(tile_s), sub) * sub   # keep user-provided tile sublane-aligned

    grid = (pl.cdiv(S, tile_s),)

    x2 = x.reshape(S, B * D)                       # free: row-major metadata-only reshape
    pe2 = pe.reshape(max_len, D).astype(x.dtype)   # squeeze size-1 batch axis; full buffer

    cost = pl.CostEstimate(
        flops=S * B * D,
        transcendentals=0,
        bytes_accessed=(2 * S * B * D + min(grid[0] * tile_s, max_len) * D) * itemsize,
    )

    out2 = pl.pallas_call(
        _add_pe_kernel,
        out_shape=jax.ShapeDtypeStruct((S, B * D), x.dtype),
        grid=grid,
        in_specs=[
            pl.BlockSpec((tile_s, B * D), lambda i: (i, 0)),   # x tile (lane-dense)
            pl.BlockSpec((tile_s, D), lambda i: (i, 0)),       # pe: [:S] expressed via grid
        ],
        out_specs=pl.BlockSpec((tile_s, B * D), lambda i: (i, 0)),
        input_output_aliases={0: 0},               # in-place add: reuse x's buffer
        compiler_params=pltpu.CompilerParams(dimension_semantics=("parallel",)),
        cost_estimate=cost,
    )(x2, pe2)

    return out2.reshape(S, B, D)


if __name__ == "__main__":
    d_model = 512     # module spec
    max_len = 64      # small max_len for the test (module default is 5000)

    pe = make_positional_encoding(max_len, d_model)          # (max_len, 1, d_model), f32

    key = jax.random.PRNGKey(0)
    k1, k2 = jax.random.split(key)

    # Case 1: multi-step grid (4 tiles) — exercises the pipelined path on both TCs.
    S1, B1 = 32, 2
    x1 = jax.random.normal(k1, (S1, B1, d_model), dtype=jnp.float32)
    ref1 = x1 + pe[:S1]                                       # reference BEFORE (x1 is donated)
    out1 = jax.block_until_ready(positional_encoding_forward(x1, pe, tile_s=8))
    assert out1.shape == (S1, B1, d_model)
    assert jnp.allclose(out1, ref1, atol=1e-6, rtol=1e-6)

    # Case 2: default tiling with a ragged sequence length (partial trailing block).
    S2, B2 = 20, 2
    x2 = jax.random.normal(k2, (S2, B2, d_model), dtype=jnp.float32)
    ref2 = x2 + pe[:S2]
    out2 = jax.block_until_ready(positional_encoding_forward(x2, pe))
    assert out2.shape == (S2, B2, d_model)
    assert jnp.allclose(out2, ref2, atol=1e-6, rtol=1e-6)

    print("KERNEL_OK")
</pallas_src>

<mosaic_0001>
module attributes {stable_mosaic.version = 11 : i64} {
  func.func @_add_pe_kernel(%arg0: i32, %arg1: memref<8x1024xf32, #tpu.memory_space<vmem>>, %arg2: memref<8x512xf32, #tpu.memory_space<vmem>>, %arg3: memref<8x1024xf32, #tpu.memory_space<vmem>>) attributes {dimension_semantics = [#tpu.dimension_semantics<parallel>], iteration_bounds = array<i64: 4>, scalar_prefetch = 0 : i64, scratch_operands = 0 : i64, tpu.core_type = #tpu.core_type<tc>, window_params = [{transform_indices = @transform_0, window_bounds = array<i64: 8, 1024>}, {transform_indices = @transform_1, window_bounds = array<i64: 8, 512>}, {transform_indices = @transform_2, window_bounds = array<i64: 8, 1024>}]} {
    %c0 = arith.constant 0 : index
    %c0_0 = arith.constant 0 : index
    %0 = vector.load %arg2[%c0, %c0_0] : memref<8x512xf32, #tpu.memory_space<vmem>>, vector<8x512xf32>
    %1 = tpu.concatenate %0, %0 in 1 : vector<8x512xf32>, vector<8x512xf32> -> vector<8x1024xf32>
    %c0_1 = arith.constant 0 : index
    %c0_2 = arith.constant 0 : index
    %2 = vector.load %arg1[%c0_1, %c0_2] : memref<8x1024xf32, #tpu.memory_space<vmem>>, vector<8x1024xf32>
    %3 = arith.addf %2, %1 : vector<8x1024xf32>
    %c0_3 = arith.constant 0 : index
    %c0_4 = arith.constant 0 : index
    %4 = vector.load %arg3[%c0_3, %c0_4] : memref<8x1024xf32, #tpu.memory_space<vmem>>, vector<8x1024xf32>
    tpu.vector_store %arg3[%c0_3, %c0_4], %3 {strides = array<i32>} : memref<8x1024xf32, #tpu.memory_space<vmem>>, vector<8x1024xf32>,
    return
  }
  func.func @transform_0(%arg0: i32) -> (i32, i32) {
    %c0_i32 = arith.constant 0 : i32
    %c0_i32_0 = arith.constant 0 : i32
    return %arg0, %c0_i32 : i32, i32
  }
  func.func @transform_1(%arg0: i32) -> (i32, i32) {
    %c0_i32 = arith.constant 0 : i32
    %c0_i32_0 = arith.constant 0 : i32
    return %arg0, %c0_i32 : i32, i32
  }
  func.func @transform_2(%arg0: i32) -> (i32, i32) {
    %c0_i32 = arith.constant 0 : i32
    %c0_i32_0 = arith.constant 0 : i32
    return %arg0, %c0_i32 : i32, i32
  }
}

</mosaic_0001>

<bundles_post_ra>
// kernel: positional_encoding_forward.1
= control target key start
LH: loop header
LB: loop body
LE: loop exit
PB: predicated region body
PF: predicated region fallthrough
CT: control target
= control target key end

     0   :  { %s306_s9 = smov 0   ;;  %s326_s0 = inlined_call_operand.vmem [shape: f32[32,1024], index: 0, kind: input, shape index: {}, may-alias: {0,2}]   ;;  %s327_s1 = inlined_call_operand.vmem [shape: f32[64,512], index: 1, kind: input, shape index: {}]   ;;  %s328_s2 = inlined_call_operand.vmem [shape: f32[32,1024], index: 2, kind: output, shape index: {}, may-alias: {0,2}]  }
   0x1 LB: > { %s259_s10 = sadd.s32 4294967295, %s289_s9   ;;  %p263_p0 = scmp.ge.s32.totalorder %s289_s9, 1  ;;  %s289_s9 = sphi %s306_s9, %s12_s9  }
   0x2   : > { %p122_p1 = scmp.lt.s32.totalorder %s289_s9, 5 }
   0x4   : > { %p123_p2 = pnand %p263_p0, %p122_p1 }
   0x5   : > { %p149_p3 = scmp.lt.s32.totalorder (!%p123_p2), %s259_s10, 3  ;;  %p154_p4 = scmp.lt.s32.totalorder (!%p123_p2), %s259_s10, 7 }
   0x6   : > { %126 = sbr.rel (%p123_p2) target bundleno = 24 (0x18), region = 28 }
   0xb   : > { %s150_s11 = scalar_select %p149_p3, %s259_s10, 3 }
   0xc   : > { %s330_s10 = smov (!%p154_p4, %s259_s10), 7 }
   0xd   : > { %s272_s12 = sshll.u32 %s150_s11, 6  ;;  %s273_s16 = sshll.u32 %s330_s10, 5 }
   0xe   : > { %s153_s15 = scalar_lea.vmem %s326_s0, %s272_s12  ;;  %s158_s19 = scalar_lea.vmem %s327_s1, %s273_s16 }
   0xf   : > { %v168_v0 = vld [vmem:[%s153_s15] sm:$0xff]  ;;  %v169_v1 = vld [vmem:[%s153_s15 + $0x8] sm:$0xff]  ;;  %v170_v2 = vld [vmem:[%s153_s15 + $0x10] sm:$0xff]  ;;  %s163_s22 = scalar_lea.vmem %s328_s2, %s272_s12 }
  0x10   : > { %v164_v3 = vld [vmem:[%s158_s19] sm:$0xff]  ;;  %v165_v4 = vld [vmem:[%s158_s19 + $0x8] sm:$0xff]  ;;  %v166_v5 = vld [vmem:[%s158_s19 + $0x10] sm:$0xff] }
  0x11   : > { %v167_v6 = vld [vmem:[%s158_s19 + $0x18] sm:$0xff]  ;;  %v172_v8 = vld [vmem:[%s153_s15 + $0x20] sm:$0xff]  ;;  %v176_v9 = vadd.f32 %v168_v0, %v164_v3  ;;  %v177_v10 = vadd.f32 %v169_v1, %v165_v4  ;;  %v178_v11 = vadd.f32 %v170_v2, %v166_v5  ;;  %v173_v12 = vld [vmem:[%s153_s15 + $0x28] sm:$0xff] }
  0x12   : > { %v171_v7 = vld [vmem:[%s153_s15 + $0x18] sm:$0xff]  ;;  %v174_v13 = vld [vmem:[%s153_s15 + $0x30] sm:$0xff]  ;;  %v180_v16 = vadd.f32 %v172_v8, %v164_v3  ;;  %v181_v17 = vadd.f32 %v173_v12, %v165_v4 }
  0x13   : > { %v175_v14 = vld [vmem:[%s153_s15 + $0x38] sm:$0xff]  ;;  %v179_v15 = vadd.f32 %v171_v7, %v167_v6  ;;  %v182_v18 = vadd.f32 %v174_v13, %v166_v5 }
  0x14   : > { %v183_v19 = vadd.f32 %v175_v14, %v167_v6  ;;  %184 = vst [vmem:[%s163_s22] sm:$0xff] %v176_v9  ;;  %185 = vst [vmem:[%s163_s22 + $0x8] sm:$0xff] %v177_v10 }
  0x15   : > { %186 = vst [vmem:[%s163_s22 + $0x10] sm:$0xff] %v178_v11  ;;  %187 = vst [vmem:[%s163_s22 + $0x18] sm:$0xff] %v179_v15 }
  0x16   : > { %188 = vst [vmem:[%s163_s22 + $0x20] sm:$0xff] %v180_v16  ;;  %189 = vst [vmem:[%s163_s22 + $0x28] sm:$0xff] %v181_v17 }
  0x17   : > { %190 = vst [vmem:[%s163_s22 + $0x30] sm:$0xff] %v182_v18  ;;  %191 = vst [vmem:[%s163_s22 + $0x38] sm:$0xff] %v183_v19 }
  0x18 PF: > { %s12_s9 = sadd.s32 1, %s289_s9  }
  0x19   : > { %p9_p5 = scmp.ge.s32.totalorder %s12_s9, 6  }
  0x1b   :  { %11 = sbr.rel (!%p9_p5) target bundleno = 1 (0x1), region = 61 }

</bundles_post_ra>
